<compile_context>
chip_gen: v7x
topology: tpu7x:2x2x1
jax: 0.10.0
libtpu: 0.0.40
codegen_flags: <defaults>
</compile_context>

<pallas_src>
import functools

import jax
import jax.numpy as jnp
from jax.experimental import pallas as pl
from jax.experimental.pallas import tpu as pltpu


# ----------------------------------------------------------------------------
# Tiled linear:  y = act(x @ w + b) [+ residual]
# ----------------------------------------------------------------------------
def _linear_kernel(act, has_residual, x_ref, w_ref, b_ref, *refs):
    if has_residual:
        r_ref, o_ref, acc_ref = refs
    else:
        r_ref = None
        o_ref, acc_ref = refs

    @pl.when(pl.program_id(2) == 0)
    def _():
        acc_ref[...] = jnp.zeros_like(acc_ref)

    # MXU matmul in the operands' storage dtype (bf16 capable), f32 accumulate.
    acc_ref[...] += jnp.dot(x_ref[...], w_ref[...],
                            preferred_element_type=jnp.float32)

    @pl.when(pl.program_id(2) == pl.num_programs(2) - 1)
    def _():
        y = acc_ref[...] + b_ref[...].astype(jnp.float32)
        if act == "quick_gelu":           # CLIP quick_gelu: x * sigmoid(1.702 x)
            y = y * jax.nn.sigmoid(1.702 * y)
        if has_residual:
            y = y + r_ref[...].astype(jnp.float32)
        o_ref[...] = y.astype(o_ref.dtype)


def _pick_tile(dim, target):
    """Largest-simple tiling: use `target` if it divides `dim`, else full dim."""
    return target if dim % target == 0 else dim


def linear(x, w, b, act=None, residual=None, *, tm=256, tn=256, tk=512):
    """y = x @ w + b (+ residual).  x: (M, K), w: (K, N), b: (N,)."""
    m, k = x.shape
    _, n = w.shape
    tm = _pick_tile(m, tm)
    tn = _pick_tile(n, tn)
    tk = _pick_tile(k, tk)
    grid = (m // tm, n // tn, k // tk)

    in_specs = [
        pl.BlockSpec((tm, tk), lambda i, j, q: (i, q)),
        pl.BlockSpec((tk, tn), lambda i, j, q: (q, j)),
        pl.BlockSpec((1, tn), lambda i, j, q: (0, j)),
    ]
    args = [x, w, b.reshape(1, n)]
    if residual is not None:
        in_specs.append(pl.BlockSpec((tm, tn), lambda i, j, q: (i, j)))
        args.append(residual)

    itemsize = jnp.dtype(x.dtype).itemsize
    cost = pl.CostEstimate(
        flops=2 * m * n * k,
        transcendentals=(m * n if act == "quick_gelu" else 0),
        bytes_accessed=(m * k + k * n + 2 * m * n
                        + (m * n if residual is not None else 0)) * itemsize,
    )

    return pl.pallas_call(
        functools.partial(_linear_kernel, act, residual is not None),
        grid=grid,
        out_shape=jax.ShapeDtypeStruct((m, n), x.dtype),
        in_specs=in_specs,
        out_specs=pl.BlockSpec((tm, tn), lambda i, j, q: (i, j)),
        scratch_shapes=[pltpu.VMEM((tm, tn), jnp.float32)],
        compiler_params=pltpu.CompilerParams(
            dimension_semantics=("parallel", "parallel", "arbitrary"),
            vmem_limit_bytes=48 * 1024 * 1024,
        ),
        cost_estimate=cost,
    )(*args)


# ----------------------------------------------------------------------------
# Row-tiled LayerNorm over the last dim of an (M, D) matrix
# ----------------------------------------------------------------------------
def _layernorm_kernel(eps, x_ref, g_ref, b_ref, o_ref):
    x = x_ref[...].astype(jnp.float32)
    mean = jnp.mean(x, axis=-1, keepdims=True)
    xc = x - mean
    var = jnp.mean(xc * xc, axis=-1, keepdims=True)
    y = xc * jax.lax.rsqrt(var + eps)
    y = y * g_ref[...].astype(jnp.float32) + b_ref[...].astype(jnp.float32)
    o_ref[...] = y.astype(o_ref.dtype)


def layernorm(x, gamma, beta, eps, *, tm=512):
    m, d = x.shape
    tm = _pick_tile(m, tm)
    return pl.pallas_call(
        functools.partial(_layernorm_kernel, eps),
        grid=(m // tm,),
        out_shape=jax.ShapeDtypeStruct((m, d), x.dtype),
        in_specs=[
            pl.BlockSpec((tm, d), lambda i: (i, 0)),
            pl.BlockSpec((1, d), lambda i: (0, 0)),
            pl.BlockSpec((1, d), lambda i: (0, 0)),
        ],
        out_specs=pl.BlockSpec((tm, d), lambda i: (i, 0)),
        compiler_params=pltpu.CompilerParams(
            dimension_semantics=("parallel",)),
    )(x, gamma.reshape(1, d), beta.reshape(1, d))


# ----------------------------------------------------------------------------
# Multi-head attention: all heads of one batch element per grid step
# ----------------------------------------------------------------------------
def _attn_kernel(scale, q_ref, k_ref, v_ref, o_ref):
    q = q_ref[0] * scale                              # (H, S, Dh)
    k = k_ref[0]
    v = v_ref[0]
    s = jnp.einsum("hqd,hkd->hqk", q, k,
                   preferred_element_type=jnp.float32)   # (H, S, S), f32
    s = s - jnp.max(s, axis=-1, keepdims=True)
    p = jnp.exp(s)
    denom = jnp.sum(p, axis=-1, keepdims=True)
    p = p * pl.reciprocal(denom, approx=True)            # EUP divide
    o = jnp.einsum("hqk,hkd->hqd", p.astype(v.dtype), v,
                   preferred_element_type=jnp.float32)
    o_ref[0] = o.astype(o_ref.dtype)


def attention(q, k, v, scale):
    """q/k/v: (B, H, S, Dh) -> (B, H, S, Dh).  Full softmax attention."""
    b, h, s, dh = q.shape
    spec = pl.BlockSpec((1, h, s, dh), lambda i: (i, 0, 0, 0))
    itemsize = jnp.dtype(q.dtype).itemsize
    cost = pl.CostEstimate(
        flops=4 * b * h * s * s * dh,
        transcendentals=b * h * s * s,
        bytes_accessed=4 * b * h * s * dh * itemsize,
    )
    # TODO(synk): for production sequence lengths (S=577, Dh=64) switch to a
    # KV-block online-softmax (flash) variant instead of the full (S, S) score.
    return pl.pallas_call(
        functools.partial(_attn_kernel, scale),
        grid=(b,),
        out_shape=jax.ShapeDtypeStruct((b, h, s, dh), q.dtype),
        in_specs=[spec, spec, spec],
        out_specs=spec,
        compiler_params=pltpu.CompilerParams(
            dimension_semantics=("parallel",)),
        cost_estimate=cost,
    )(q, k, v)


# ----------------------------------------------------------------------------
# CLIP vision transformer (last_hidden_state, matches HF CLIPVisionModel)
# ----------------------------------------------------------------------------
def encoder_layer(x, lp, cfg):
    B, S, D = x.shape
    H = cfg["heads"]
    Dh = D // H
    eps = cfg["eps"]
    x2 = x.reshape(B * S, D)

    # --- self attention block ---
    h = layernorm(x2, lp["ln1_g"], lp["ln1_b"], eps)
    qkv = linear(h, lp["qkv_w"], lp["qkv_b"])             # (B*S, 3D) fused QKV
    qkv = qkv.reshape(B, S, 3, H, Dh).transpose(2, 0, 3, 1, 4)  # (3, B, H, S, Dh)
    a = attention(qkv[0], qkv[1], qkv[2], Dh ** -0.5)     # (B, H, S, Dh)
    a = a.transpose(0, 2, 1, 3).reshape(B * S, D)
    x2 = linear(a, lp["o_w"], lp["o_b"], residual=x2)     # out-proj + residual

    # --- MLP block ---
    h = layernorm(x2, lp["ln2_g"], lp["ln2_b"], eps)
    h = linear(h, lp["fc1_w"], lp["fc1_b"], act="quick_gelu")
    x2 = linear(h, lp["fc2_w"], lp["fc2_b"], residual=x2)  # fc2 + residual
    return x2.reshape(B, S, D)


def clip_vision_forward(params, pixel_values, cfg):
    B, C, Himg, Wimg = pixel_values.shape
    p = cfg["patch_size"]
    D = cfg["hidden"]
    gh, gw = Himg // p, Wimg // p

    # Unfold NCHW image into patch rows (== Conv2d stride=kernel=patch).
    patches = pixel_values.reshape(B, C, gh, p, gw, p)
    patches = patches.transpose(0, 2, 4, 1, 3, 5).reshape(B * gh * gw, C * p * p)

    # Patch embedding (Conv2d, bias=False) as a Pallas matmul.
    x = linear(patches, params["patch_w"], params["patch_b"])
    x = x.reshape(B, gh * gw, D)

    cls = jnp.broadcast_to(params["class_emb"].reshape(1, 1, D), (B, 1, D))
    x = jnp.concatenate([cls, x], axis=1)            # (B, S, D), S = patches + 1
    x = x + params["pos_emb"][None, :, :]
    S = x.shape[1]

    x = layernorm(x.reshape(B * S, D), params["pre_ln_g"], params["pre_ln_b"],
                  cfg["eps"]).reshape(B, S, D)

    for lp in params["layers"]:
        x = encoder_layer(x, lp, cfg)

    # HF returns the encoder output as 'last_hidden_state' (post_layernorm is
    # only applied to the pooled CLS token, which CLIPJZ.forward does not use).
    return x


def clip_jz_forward(params, batch, cfg):
    """Pallas equivalent of CLIPJZ.forward(x) -> last_hidden_state."""
    return clip_vision_forward(params, batch["img"], cfg)


# ----------------------------------------------------------------------------
# Deterministic synthetic parameter init (shapes follow CLIPVisionConfig-style)
# ----------------------------------------------------------------------------
def init_params(key, cfg):
    D, I, C = cfg["hidden"], cfg["intermediate"], cfg["channels"]
    p = cfg["patch_size"]
    n_pos = (cfg["image_size"] // p) ** 2 + 1
    keys = iter(jax.random.split(key, 256))

    def w(shape, scale=0.02):
        return scale * jax.random.normal(next(keys), shape, jnp.float32)

    params = {
        "patch_w": w((C * p * p, D)),
        "patch_b": jnp.zeros((D,), jnp.float32),     # Conv2d(..., bias=False)
        "class_emb": w((D,)),
        "pos_emb": w((n_pos, D)),
        "pre_ln_g": jnp.ones((D,), jnp.float32),
        "pre_ln_b": jnp.zeros((D,), jnp.float32),
        "layers": [],
    }
    for _ in range(cfg["layers"]):
        params["layers"].append({
            "ln1_g": jnp.ones((D,), jnp.float32), "ln1_b": jnp.zeros((D,), jnp.float32),
            # fused QKV projection: columns [0:D]=Q, [D:2D]=K, [2D:3D]=V
            "qkv_w": w((D, 3 * D)), "qkv_b": jnp.zeros((3 * D,), jnp.float32),
            "o_w": w((D, D)), "o_b": jnp.zeros((D,), jnp.float32),
            "ln2_g": jnp.ones((D,), jnp.float32), "ln2_b": jnp.zeros((D,), jnp.float32),
            "fc1_w": w((D, I)), "fc1_b": jnp.zeros((I,), jnp.float32),
            "fc2_w": w((I, D)), "fc2_b": jnp.zeros((D,), jnp.float32),
        })
    return params


# ----------------------------------------------------------------------------
if __name__ == "__main__":
    cfg = dict(
        image_size=16,
        patch_size=4,
        channels=3,
        hidden=32,
        heads=2,
        intermediate=64,
        layers=2,
        eps=1e-5,
    )
    key = jax.random.PRNGKey(0)
    key_p, key_x = jax.random.split(key)
    params = init_params(key_p, cfg)

    # Input batch: dict with "img" in NCHW, like the PyTorch module expects.
    img = jax.random.normal(key_x, (2, cfg["channels"], cfg["image_size"],
                                    cfg["image_size"]), jnp.float32)
    batch = {"img": img}

    out = clip_jz_forward(params, batch, cfg)
    out = jax.block_until_ready(out)
    assert out.shape == (2, (cfg["image_size"] // cfg["patch_size"]) ** 2 + 1,
                         cfg["hidden"]), out.shape
    print("KERNEL_OK")
</pallas_src>

<mosaic_0001>
module attributes {stable_mosaic.version = 11 : i64} {
  func.func @_linear_kernel(%arg0: i32, %arg1: i32, %arg2: i32, %arg3: memref<32x48xf32, #tpu.memory_space<vmem>>, %arg4: memref<48x32xf32, #tpu.memory_space<vmem>>, %arg5: memref<1x32xf32, #tpu.memory_space<vmem>>, %arg6: memref<32x32xf32, #tpu.memory_space<vmem>>, %arg7: memref<32x32xf32, #tpu.memory_space<vmem>>) attributes {dimension_semantics = [#tpu.dimension_semantics<parallel>, #tpu.dimension_semantics<parallel>, #tpu.dimension_semantics<arbitrary>], iteration_bounds = array<i64: 1, 1, 1>, scalar_prefetch = 0 : i64, scratch_operands = 1 : i64, tpu.core_type = #tpu.core_type<tc>, window_params = [{transform_indices = @transform_0, window_bounds = array<i64: 32, 48>}, {transform_indices = @transform_1, window_bounds = array<i64: 48, 32>}, {transform_indices = @transform_2, window_bounds = array<i64: 1, 32>}, {transform_indices = @transform_3, window_bounds = array<i64: 32, 32>}]} {
    %c0_i32 = arith.constant 0 : i32
    %0 = arith.cmpi eq, %arg2, %c0_i32 : i32
    %1 = arith.extui %0 : i1 to i32
    %c0_i32_0 = arith.constant 0 : i32
    %2 = arith.cmpi ne, %1, %c0_i32_0 : i32
    scf.if %2 {
      %cst_10 = arith.constant 0.000000e+00 : f32
      %12 = vector.broadcast %cst_10 : f32 to vector<32x32xf32>
      %c0_11 = arith.constant 0 : index
      %c0_12 = arith.constant 0 : index
      %13 = vector.load %arg7[%c0_11, %c0_12] : memref<32x32xf32, #tpu.memory_space<vmem>>, vector<32x32xf32>
      tpu.vector_store %arg7[%c0_11, %c0_12], %12 {strides = array<i32>} : memref<32x32xf32, #tpu.memory_space<vmem>>, vector<32x32xf32>,
    } else {
    }
    %c0 = arith.constant 0 : index
    %c0_1 = arith.constant 0 : index
    %3 = vector.load %arg7[%c0, %c0_1] : memref<32x32xf32, #tpu.memory_space<vmem>>, vector<32x32xf32>
    %c0_2 = arith.constant 0 : index
    %c0_3 = arith.constant 0 : index
    %4 = vector.load %arg3[%c0_2, %c0_3] : memref<32x48xf32, #tpu.memory_space<vmem>>, vector<32x48xf32>
    %c0_4 = arith.constant 0 : index
    %c0_5 = arith.constant 0 : index
    %5 = vector.load %arg4[%c0_4, %c0_5] : memref<48x32xf32, #tpu.memory_space<vmem>>, vector<48x32xf32>
    %cst = arith.constant dense<0.000000e+00> : vector<32x32xf32>
    %6 = tpu.matmul %4, %5, %cst {dimension_numbers = #tpu.dot_dimension_numbers<[1], [0], [0], [1], [0, 0, 1, 1], [], []>} : vector<32x48xf32>, vector<48x32xf32>, vector<32x32xf32> -> vector<32x32xf32>
    %7 = arith.addf %3, %6 : vector<32x32xf32>
    %c0_6 = arith.constant 0 : index
    %c0_7 = arith.constant 0 : index
    %8 = vector.load %arg7[%c0_6, %c0_7] : memref<32x32xf32, #tpu.memory_space<vmem>>, vector<32x32xf32>
    tpu.vector_store %arg7[%c0_6, %c0_7], %7 {strides = array<i32>} : memref<32x32xf32, #tpu.memory_space<vmem>>, vector<32x32xf32>,
    %c0_i32_8 = arith.constant 0 : i32
    %9 = arith.cmpi eq, %arg2, %c0_i32_8 : i32
    %10 = arith.extui %9 : i1 to i32
    %c0_i32_9 = arith.constant 0 : i32
    %11 = arith.cmpi ne, %10, %c0_i32_9 : i32
    scf.if %11 {
      %c0_10 = arith.constant 0 : index
      %c0_11 = arith.constant 0 : index
      %12 = vector.load %arg7[%c0_10, %c0_11] : memref<32x32xf32, #tpu.memory_space<vmem>>, vector<32x32xf32>
      %c0_12 = arith.constant 0 : index
      %c0_13 = arith.constant 0 : index
      %13 = vector.load %arg5[%c0_12, %c0_13] : memref<1x32xf32, #tpu.memory_space<vmem>>, vector<1x32xf32>
      %14 = vector.broadcast %13 : vector<1x32xf32> to vector<32x32xf32>
      %15 = arith.addf %12, %14 : vector<32x32xf32>
      %c0_14 = arith.constant 0 : index
      %c0_15 = arith.constant 0 : index
      %16 = vector.load %arg6[%c0_14, %c0_15] : memref<32x32xf32, #tpu.memory_space<vmem>>, vector<32x32xf32>
      tpu.vector_store %arg6[%c0_14, %c0_15], %15 {strides = array<i32>} : memref<32x32xf32, #tpu.memory_space<vmem>>, vector<32x32xf32>,
    } else {
    }
    return
  }
  func.func @transform_0(%arg0: i32, %arg1: i32, %arg2: i32) -> (i32, i32) {
    %c0_i32 = arith.constant 0 : i32
    return %arg0, %arg2 : i32, i32
  }
  func.func @transform_1(%arg0: i32, %arg1: i32, %arg2: i32) -> (i32, i32) {
    %c0_i32 = arith.constant 0 : i32
    return %arg2, %arg1 : i32, i32
  }
  func.func @transform_2(%arg0: i32, %arg1: i32, %arg2: i32) -> (i32, i32) {
    %c0_i32 = arith.constant 0 : i32
    %c0_i32_0 = arith.constant 0 : i32
    return %c0_i32, %arg1 : i32, i32
  }
  func.func @transform_3(%arg0: i32, %arg1: i32, %arg2: i32) -> (i32, i32) {
    %c0_i32 = arith.constant 0 : i32
    return %arg0, %arg1 : i32, i32
  }
}

</mosaic_0001>

<bundles_post_ra>
// kernel: tpu_custom_call.1
= control target key start
LH: loop header
LB: loop body
LE: loop exit
PB: predicated region body
PF: predicated region fallthrough
CT: control target
= control target key end

     0   :  { %vm19_vm0 = vcmask 261120   ;;  %v262_v5 = vmov 0.0   ;;  %vm38_vm1 = vcmask 392192   ;;  %s347_s0 = inlined_call_operand.vmem [shape: f32[32,48], index: 0, kind: input, shape index: {}]   ;;  %s348_s1 = inlined_call_operand.vmem [shape: f32[48,32], index: 1, kind: input, shape index: {}]   ;;  %s349_s2 = inlined_call_operand.vmem [shape: f32[1,32], index: 2, kind: input, shape index: {}]   ;;  %s350_s3 = inlined_call_operand.hbm [shape: f32[32,32], index: 3, kind: output, shape index: {}]  }
   0x1   :  { %v32_v0 = vld [vmem:[%s348_s1] sm:$0xff]  ;;  %v33_v1 = vld [vmem:[%s348_s1 + $0x8] sm:$0xff]  ;;  %v34_v2 = vld [vmem:[%s348_s1 + $0x10] sm:$0xff]  ;;  %21 = vst.msk [vmem:[#allocation2 + $0x8] sm:$0xff] %vm19_vm0, %v262_v5 }
   0x2   :  { %v216_v3 = vpack.c.bf16 %v33_v1, %v32_v0  ;;  %v35_v4 = vld [vmem:[%s348_s1 + $0x18] sm:$0xff]  ;;  %20 = vst.msk [vmem:[#allocation2] sm:$0xff] %vm19_vm0, %v262_v5  ;;  %22 = vst.msk [vmem:[#allocation2 + $0x10] sm:$0xff] %vm19_vm0, %v262_v5  ;;  %v36_v7 = vld [vmem:[%s348_s1 + $0x20] sm:$0xff] }
   0x3   :  { %23 = vst.msk [vmem:[#allocation2 + $0x18] sm:$0xff] %vm19_vm0, %v262_v5  ;;  %v220_v6 = vpack.c.bf16 %v35_v4, %v34_v2  ;;  %v37_v8 = vld [vmem:[%s348_s1 + $0x28] sm:$0xff]  ;;  %v28_v9 = vld [vmem:[%s347_s0] sm:$0xff]  ;;  %v30_v10 = vld [vmem:[%s347_s0 + $0x10] sm:$0xff] }
   0x4   :  { %217 = vmatprep.subr.bf16.mxu0 %v216_v3  ;;  %228 = vmatprep.subr.bf16.mxu1 %v216_v3 }
   0x5   :  { %8 = vsyncpa [#allocation4], 0  ;;  %219 = vmatpush3.bf16.msra.mxu0 %v216_v3  ;;  %231 = vmatpush3.bf16.msra.mxu1 %v216_v3  ;;  %v224_v11 = vpack.c.bf16 %v37_v8, %v36_v7  ;;  %v29_v12 = vld [vmem:[%s347_s0 + $0x8] sm:$0xff]  ;;  %v31_v13 = vld [vmem:[%s347_s0 + $0x18] sm:$0xff]  ;;  %s263_s5 = smov [#allocation3]  }
   0x6   :  { %221 = vmatprep.subr.bf16.mxu0 %v220_v6  ;;  %229 = vmatprep.subr.bf16.mxu1 %v220_v6  ;;  %v187_v26 = vld [vmem:[%s349_s2] ss:$0 sm:$0xff]  ;;  %s172_s6 = sshll.u32 %s263_s5, 4  ;;  %s173_s6 = int_to_ptr.vmem [resolvable:$true] %s172_s6 }
   0x7   :  { %210 = vmatprep.mubr.msk.f32.mxu0 %vm38_vm1, %v28_v9  ;;  %213 = vmatprep.mubr.msk.f32.mxu1 %vm38_vm1, %v30_v10  ;;  %s238_s2 = scalar_lea.vmem %s173_s6, 512  ;;  %p243_p1 = scmp.lt.s32.totalorder %s173_s6, %s173_s6 }
   0x8   :  { %v25_v14 = vld [vmem:[#allocation2 + $0x8] sm:$0xff]  ;;  %p239_p0 = scmp.ne.s32.totalorder %s173_s6, %s238_s2  ;;  %p244_p2 = scmp.lt.s32.totalorder %s238_s2, %s238_s2 }
   0x9   :  { %223 = vmatpush3.bf16.msra.mxu0 %v220_v6  ;;  %232 = vmatpush3.bf16.msra.mxu1 %v220_v6  ;;  %v24_v16 = vld [vmem:[#allocation2] sm:$0xff]  ;;  %v26_v17 = vld [vmem:[#allocation2 + $0x10] sm:$0xff] }
   0xa   :  { %225 = vmatprep.subr.bf16.mxu0 %v224_v11  ;;  %230 = vmatprep.subr.bf16.mxu1 %v224_v11  ;;  %v27_v15 = vld [vmem:[#allocation2 + $0x18] sm:$0xff]  ;;  %p245_p3 = por %p244_p2, %p243_p1 }
   0xc   :  { %p246_p4 = pnand %p245_p3, %p239_p0 }
   0xd   :  { %227 = vmatpush3.bf16.msra.mxu0 %v224_v11  ;;  %233 = vmatpush3.bf16.msra.mxu1 %v224_v11 }
  0x10   :  { %211 = vmatmul.mubr.msk.f32.vlgmr.msra.gmra.mrb[0].mxu0 %vm38_vm1, %v29_v12  ;;  %214 = vmatmul.mubr.msk.f32.vlgmr.msra.gmra.mrb[0].mxu1 %vm38_vm1, %v31_v13 }
  0xe3   :  { %v212_v18 = vpop.f32.mrb[0].mxu0  ;;  %v215_v19 = vpop.f32.mrb[0].mxu1 }
  0xe4   :  { %v137_v20 = vadd.f32 %v212_v18, %v25_v14  ;;  %v139_v21 = vadd.f32 %v215_v19, %v27_v15  ;;  %v117_v22 = vpop.f32.mrb[1].mxu0  ;;  %v127_v23 = vpop.f32.mrb[1].mxu1 }
  0xe5   :  { %v136_v24 = vadd.f32 %v117_v22, %v24_v16  ;;  %v138_v25 = vadd.f32 %v127_v23, %v26_v17 }
  0xe6   :  { %142 = vst.msk [vmem:[#allocation2 + $0x8] sm:$0xff] %vm19_vm0, %v137_v20  ;;  %144 = vst.msk [vmem:[#allocation2 + $0x18] sm:$0xff] %vm19_vm0, %v139_v21 }
  0xe7   :  { %141 = vst.msk [vmem:[#allocation2] sm:$0xff] %vm19_vm0, %v136_v24  ;;  %143 = vst.msk [vmem:[#allocation2 + $0x10] sm:$0xff] %vm19_vm0, %v138_v25 }
  0xed   :  { %v149_v27 = vld [vmem:[#allocation2 + $0x8] sm:$0xff]  ;;  %v151_v28 = vld [vmem:[#allocation2 + $0x18] sm:$0xff] }
  0xee   :  { %v148_v29 = vld [vmem:[#allocation2] sm:$0xff]  ;;  %v150_v30 = vld [vmem:[#allocation2 + $0x10] sm:$0xff]  ;;  %v160_v31 = vadd.f32 %v187_v26, %v149_v27  ;;  %v162_v32 = vadd.f32 %v187_v26, %v151_v28 }
  0xef   :  { %v159_v33 = vadd.f32 %v187_v26, %v148_v29  ;;  %v161_v34 = vadd.f32 %v187_v26, %v150_v30 }
  0xf0   :  { %164 = vst.msk [vmem:[#allocation3 + $0x8] sm:$0xff] %vm19_vm0, %v160_v31  ;;  %166 = vst.msk [vmem:[#allocation3 + $0x18] sm:$0xff] %vm19_vm0, %v162_v32 }
  0xf1   :  { %163 = vst.msk [vmem:[#allocation3] sm:$0xff] %vm19_vm0, %v159_v33  ;;  %165 = vst.msk [vmem:[#allocation3 + $0x10] sm:$0xff] %vm19_vm0, %v161_v34 }
  0xf2   :  { %249 = shalt.err (!%p246_p4)
}
  0xf3   :  { %s250_s9 = scalar_lea.hbm %s350_s3, 512 }
  0xf4   :  { %p251_p5 = scmp.ne.s32.totalorder %s350_s3, %s250_s9  ;;  %p254_p6 = scmp.lt.u32.totalorder %s250_s9, %s350_s3 }
  0xf6   :  { %p256_p7 = pnand %p254_p6, %p251_p5 }
  0xf8   :  { %259 = shalt.err (!%p256_p7)
}
  0xf9   :  { %s264_s14 = smov 128   ;;  %s265_s15 = smov 8  }
  0xfa   :  { %178 = dma.vmem_to_hbm [thread:$0]  %s173_s6, 512, %s350_s3, [#allocation4], %s264_s14, %s264_s14, %s265_s15  }
  0xfb   :  { %260 = dma.done.wait [#allocation4], 512  }
  0xfc   :  { %261 = vsyncadd [#allocation4], 4294966784 }
  0xfd   :  { %182 = vsyncpa [#allocation4], 1 }

</bundles_post_ra>
